<compile_context>
chip_gen: v5e
topology: v5e:2x2
jax: 0.10.0
libtpu: 0.0.40
codegen_flags: <defaults>
</compile_context>

<pallas_src>
import jax
import jax.numpy as jnp
from jax import lax
from jax.experimental import pallas as pl
from jax.experimental.pallas import tpu as pltpu


def _round_up(x, m):
    return ((x + m - 1) // m) * m


def _ebm_kernel(z_ref, w1_ref, b1_ref, w2_ref, b2_ref, w3_ref, b3_ref,
                w4_ref, logz_ref, out_ref):
    """One batch tile. z arrives in natural (TB, nz) layout; layer 1 contracts
    over nz so activations live as (ndf, TB) with the batch on lanes."""
    x = z_ref[...]                                             # (TB, nz) bf16

    # Layer 1: h = W1 @ x.T  -> (ndf, TB); f32 accumulation on the MXU.
    h = lax.dot_general(w1_ref[...], x,
                        dimension_numbers=(((1,), (1,)), ((), ())),
                        preferred_element_type=jnp.float32)
    h = h + b1_ref[...]                                        # (ndf, TB) f32
    h = jnp.maximum(h, 0.2 * h)                                # LeakyReLU(0.2)

    # Layer 2: Linear(ndf, ndf) + LeakyReLU(0.2)
    h = jnp.dot(w2_ref[...], h.astype(jnp.bfloat16),
                preferred_element_type=jnp.float32) + b2_ref[...]
    h = jnp.maximum(h, 0.2 * h)

    # Layer 3: Linear(ndf, ndf) + LeakyReLU(0.2)
    h = jnp.dot(w3_ref[...], h.astype(jnp.bfloat16),
                preferred_element_type=jnp.float32) + b3_ref[...]
    h = jnp.maximum(h, 0.2 * h)

    # Layer 4: Linear(ndf, 1, bias=False) as VPU multiply + sublane reduction
    # (avoids a single-column MXU matmul); result is lane-dense (1, TB).
    e = jnp.sum(h * w4_ref[...], axis=0, keepdims=True)        # (1, TB) f32

    # energy + log_partition (scalar read from SMEM)
    out_ref[...] = e + logz_ref[0, 0]


def e_celeba_forward(z, params, *, tb=512):
    """z: (B, nz, ...) with trailing singleton dims. Returns (B, 1) f32."""
    w1, b1, w2, b2, w3, b3, w4, logz = params
    B = z.shape[0]
    z2d = z.reshape(B, -1)                 # robust replacement for z.squeeze()
    nz = z2d.shape[1]
    ndf = w1.shape[0]

    # Tile selection: lanes come in multiples of 128; cap at `tb` (h is TB/16
    # f32 vregs, so 512 avoids spills), and aim for >= 2 grid steps when B
    # allows it so the "parallel" grid axis shards across v7x's two TCs.
    half = _round_up(max(1, -(-B // 2)), 128)
    tile = max(128, min(tb, half))
    b_pad = _round_up(B, tile)
    grid = (b_pad // tile,)

    # Natural (B, nz) layout: the only wrapper-side pass over z is a fused
    # bf16 cast + zero pad (no HBM transpose round-trip).
    z_p = jnp.pad(z2d.astype(jnp.bfloat16), ((0, b_pad - B), (0, 0)))

    flops = 2 * b_pad * (nz * ndf + 2 * ndf * ndf + ndf)
    bytes_accessed = (b_pad * nz * 2                         # z (bf16)
                      + (ndf * nz + 2 * ndf * ndf) * 2       # W1..W3 (bf16)
                      + (4 * ndf + 1) * 4                    # biases, w4, logZ
                      + b_pad * 4)                           # output

    out = pl.pallas_call(
        _ebm_kernel,
        out_shape=jax.ShapeDtypeStruct((1, b_pad), jnp.float32),
        grid=grid,
        in_specs=[
            pl.BlockSpec((tile, nz), lambda i: (i, 0)),        # z tile (pipelined)
            pl.BlockSpec((ndf, nz), lambda i: (0, 0)),         # W1 (resident)
            pl.BlockSpec((ndf, 1), lambda i: (0, 0)),          # b1
            pl.BlockSpec((ndf, ndf), lambda i: (0, 0)),        # W2
            pl.BlockSpec((ndf, 1), lambda i: (0, 0)),          # b2
            pl.BlockSpec((ndf, ndf), lambda i: (0, 0)),        # W3
            pl.BlockSpec((ndf, 1), lambda i: (0, 0)),          # b3
            pl.BlockSpec((ndf, 1), lambda i: (0, 0)),          # w4 (f32, VPU path)
            pl.BlockSpec(memory_space=pltpu.MemorySpace.SMEM), # log_partition
        ],
        out_specs=pl.BlockSpec((1, tile), lambda i: (0, i)),   # lane-dense slab
        compiler_params=pltpu.CompilerParams(
            dimension_semantics=("parallel",)),
        cost_estimate=pl.CostEstimate(
            flops=flops, transcendentals=0, bytes_accessed=bytes_accessed),
    )(z_p,
      w1.astype(jnp.bfloat16), b1,
      w2.astype(jnp.bfloat16), b2,
      w3.astype(jnp.bfloat16), b3,
      w4, logz)

    return out[0, :B][:, None]                                 # (B, 1)


def init_params(key, nz, ndf):
    """Synthetic init matching nn.Linear shapes.

    Weights are kept in PyTorch's native (out_features, in_features) layout;
    biases and the final weight are stored as (ndf, 1) columns so the kernel
    can broadcast them along the lane (batch) axis.
    """
    ks = jax.random.split(key, 7)

    def uni(k, shape, fan_in):
        bound = 1.0 / jnp.sqrt(fan_in)
        return jax.random.uniform(k, shape, jnp.float32, -bound, bound)

    w1 = uni(ks[0], (ndf, nz), nz)
    b1 = uni(ks[1], (ndf, 1), nz)
    w2 = uni(ks[2], (ndf, ndf), ndf)
    b2 = uni(ks[3], (ndf, 1), ndf)
    w3 = uni(ks[4], (ndf, ndf), ndf)
    b3 = uni(ks[5], (ndf, 1), ndf)
    w4 = uni(ks[6], (ndf, 1), ndf)                 # Linear(ndf, 1, bias=False)
    log_partition = jnp.zeros((1, 1), jnp.float32)  # torch.tensor(0.0)
    return (w1, b1, w2, b2, w3, b3, w4, log_partition)


def _reference(z, params, compute_dtype=jnp.bfloat16):
    """Pure-JAX reference.

    compute_dtype=bfloat16 mirrors the kernel's MXU numerics exactly;
    compute_dtype=float32 is the exact PyTorch (full-precision) semantics.
    """
    w1, b1, w2, b2, w3, b3, w4, logz = params
    B = z.shape[0]
    h = z.reshape(B, -1).astype(jnp.float32)
    for w, b in ((w1, b1), (w2, b2), (w3, b3)):
        h = jnp.dot(h.astype(compute_dtype), w.astype(compute_dtype).T,
                    preferred_element_type=jnp.float32,
                    precision=jax.lax.Precision.HIGHEST) + b[:, 0]
        h = jnp.where(h > 0, h, 0.2 * h)
    e = jnp.sum(h * w4[:, 0], axis=-1, keepdims=True)          # Linear(ndf, 1)
    return e + logz[0, 0]


if __name__ == "__main__":
    nz, ndf, B = 32, 64, 8
    key = jax.random.PRNGKey(0)
    kz, kp = jax.random.split(key)

    # latent in the NCHW-style shape the CelebA EBM sees: (B, nz, 1, 1)
    z = jax.random.normal(kz, (B, nz, 1, 1), jnp.float32)
    params = init_params(kp, nz, ndf)

    energy = e_celeba_forward(z, params)
    jax.block_until_ready(energy)
    assert energy.shape == (B, 1)

    # Tight check against a reference using the kernel's bf16-in / f32-accum
    # numerics, plus a looser check against the exact f32 PyTorch semantics.
    ref_bf16 = _reference(z, params, jnp.bfloat16)
    ref_f32 = _reference(z, params, jnp.float32)
    assert jnp.allclose(energy, ref_bf16, atol=1e-3, rtol=1e-3), \
        float(jnp.max(jnp.abs(energy - ref_bf16)))
    assert jnp.allclose(energy, ref_f32, atol=5e-2, rtol=5e-2), \
        float(jnp.max(jnp.abs(energy - ref_f32)))

    # Also exercise a batch large enough to produce a multi-step grid
    # (tile shrinks to give >= 2 steps -> both v7x TCs get work).
    B2 = 300
    z2 = jax.random.normal(kz, (B2, nz, 1, 1), jnp.float32)
    energy2 = e_celeba_forward(z2, params)
    jax.block_until_ready(energy2)
    assert energy2.shape == (B2, 1)
    assert jnp.allclose(energy2, _reference(z2, params, jnp.bfloat16),
                        atol=1e-3, rtol=1e-3)

    print("KERNEL_OK")
</pallas_src>

<mosaic_0001>
module attributes {stable_mosaic.version = 11 : i64} {
  func.func @_ebm_kernel(%arg0: i32, %arg1: memref<128x32xbf16, #tpu.memory_space<vmem>>, %arg2: memref<64x32xbf16, #tpu.memory_space<vmem>>, %arg3: memref<64x1xf32, #tpu.memory_space<vmem>>, %arg4: memref<64x64xbf16, #tpu.memory_space<vmem>>, %arg5: memref<64x1xf32, #tpu.memory_space<vmem>>, %arg6: memref<64x64xbf16, #tpu.memory_space<vmem>>, %arg7: memref<64x1xf32, #tpu.memory_space<vmem>>, %arg8: memref<64x1xf32, #tpu.memory_space<vmem>>, %arg9: memref<1x1xf32, #tpu.memory_space<smem>>, %arg10: memref<1x128xf32, #tpu.memory_space<vmem>>) attributes {dimension_semantics = [#tpu.dimension_semantics<parallel>], iteration_bounds = array<i64: 1>, scalar_prefetch = 0 : i64, scratch_operands = 0 : i64, tpu.core_type = #tpu.core_type<tc>, window_params = [{transform_indices = @transform_0, window_bounds = array<i64: 128, 32>}, {pipeline_mode = #tpu.pipeline_mode<synchronous>, transform_indices = @transform_1, window_bounds = array<i64: 64, 32>}, {pipeline_mode = #tpu.pipeline_mode<synchronous>, transform_indices = @transform_2, window_bounds = array<i64: 64, 1>}, {pipeline_mode = #tpu.pipeline_mode<synchronous>, transform_indices = @transform_3, window_bounds = array<i64: 64, 64>}, {pipeline_mode = #tpu.pipeline_mode<synchronous>, transform_indices = @transform_4, window_bounds = array<i64: 64, 1>}, {pipeline_mode = #tpu.pipeline_mode<synchronous>, transform_indices = @transform_5, window_bounds = array<i64: 64, 64>}, {pipeline_mode = #tpu.pipeline_mode<synchronous>, transform_indices = @transform_6, window_bounds = array<i64: 64, 1>}, {pipeline_mode = #tpu.pipeline_mode<synchronous>, transform_indices = @transform_7, window_bounds = array<i64: 64, 1>}, {transform_indices = @transform_8, window_bounds = array<i64: 1, 1>}, {transform_indices = @transform_9, window_bounds = array<i64: 1, 128>}]} {
    %c0 = arith.constant 0 : index
    %c0_0 = arith.constant 0 : index
    %0 = vector.load %arg1[%c0, %c0_0] : memref<128x32xbf16, #tpu.memory_space<vmem>>, vector<128x32xbf16>
    %c0_1 = arith.constant 0 : index
    %c0_2 = arith.constant 0 : index
    %1 = vector.load %arg2[%c0_1, %c0_2] : memref<64x32xbf16, #tpu.memory_space<vmem>>, vector<64x32xbf16>
    %cst = arith.constant dense<0.000000e+00> : vector<64x128xf32>
    %2 = tpu.matmul %1, %0, %cst {dimension_numbers = #tpu.dot_dimension_numbers<[1], [1], [0], [0], [0, 0, 1, 0], [], []>} : vector<64x32xbf16>, vector<128x32xbf16>, vector<64x128xf32> -> vector<64x128xf32>
    %c0_3 = arith.constant 0 : index
    %c0_4 = arith.constant 0 : index
    %3 = vector.load %arg3[%c0_3, %c0_4] : memref<64x1xf32, #tpu.memory_space<vmem>>, vector<64x1xf32>
    %4 = vector.broadcast %3 : vector<64x1xf32> to vector<64x128xf32>
    %5 = arith.addf %2, %4 : vector<64x128xf32>
    %cst_5 = arith.constant 2.000000e-01 : f32
    %6 = vector.broadcast %cst_5 : f32 to vector<64x128xf32>
    %7 = arith.mulf %6, %5 : vector<64x128xf32>
    %8 = arith.maximumf %5, %7 : vector<64x128xf32>
    %c0_6 = arith.constant 0 : index
    %c0_7 = arith.constant 0 : index
    %9 = vector.load %arg4[%c0_6, %c0_7] : memref<64x64xbf16, #tpu.memory_space<vmem>>, vector<64x64xbf16>
    %10 = arith.truncf %8 : vector<64x128xf32> to vector<64x128xbf16>
    %cst_8 = arith.constant dense<0.000000e+00> : vector<64x128xf32>
    %11 = tpu.matmul %9, %10, %cst_8 {dimension_numbers = #tpu.dot_dimension_numbers<[1], [0], [0], [1], [0, 0, 1, 1], [], []>} : vector<64x64xbf16>, vector<64x128xbf16>, vector<64x128xf32> -> vector<64x128xf32>
    %c0_9 = arith.constant 0 : index
    %c0_10 = arith.constant 0 : index
    %12 = vector.load %arg5[%c0_9, %c0_10] : memref<64x1xf32, #tpu.memory_space<vmem>>, vector<64x1xf32>
    %13 = vector.broadcast %12 : vector<64x1xf32> to vector<64x128xf32>
    %14 = arith.addf %11, %13 : vector<64x128xf32>
    %cst_11 = arith.constant 2.000000e-01 : f32
    %15 = vector.broadcast %cst_11 : f32 to vector<64x128xf32>
    %16 = arith.mulf %15, %14 : vector<64x128xf32>
    %17 = arith.maximumf %14, %16 : vector<64x128xf32>
    %c0_12 = arith.constant 0 : index
    %c0_13 = arith.constant 0 : index
    %18 = vector.load %arg6[%c0_12, %c0_13] : memref<64x64xbf16, #tpu.memory_space<vmem>>, vector<64x64xbf16>
    %19 = arith.truncf %17 : vector<64x128xf32> to vector<64x128xbf16>
    %cst_14 = arith.constant dense<0.000000e+00> : vector<64x128xf32>
    %20 = tpu.matmul %18, %19, %cst_14 {dimension_numbers = #tpu.dot_dimension_numbers<[1], [0], [0], [1], [0, 0, 1, 1], [], []>} : vector<64x64xbf16>, vector<64x128xbf16>, vector<64x128xf32> -> vector<64x128xf32>
    %c0_15 = arith.constant 0 : index
    %c0_16 = arith.constant 0 : index
    %21 = vector.load %arg7[%c0_15, %c0_16] : memref<64x1xf32, #tpu.memory_space<vmem>>, vector<64x1xf32>
    %22 = vector.broadcast %21 : vector<64x1xf32> to vector<64x128xf32>
    %23 = arith.addf %20, %22 : vector<64x128xf32>
    %cst_17 = arith.constant 2.000000e-01 : f32
    %24 = vector.broadcast %cst_17 : f32 to vector<64x128xf32>
    %25 = arith.mulf %24, %23 : vector<64x128xf32>
    %26 = arith.maximumf %23, %25 : vector<64x128xf32>
    %c0_18 = arith.constant 0 : index
    %c0_19 = arith.constant 0 : index
    %27 = vector.load %arg8[%c0_18, %c0_19] : memref<64x1xf32, #tpu.memory_space<vmem>>, vector<64x1xf32>
    %28 = vector.broadcast %27 : vector<64x1xf32> to vector<64x128xf32>
    %29 = arith.mulf %26, %28 : vector<64x128xf32>
    %cst_20 = arith.constant dense<0.000000e+00> : vector<128xf32>
    %30 = vector.multi_reduction <add>, %29, %cst_20 [0] : vector<64x128xf32> to vector<128xf32>
    %31 = vector.shape_cast %30 : vector<128xf32> to vector<1x128xf32>
    %c0_21 = arith.constant 0 : index
    %c0_22 = arith.constant 0 : index
    %32 = memref.load %arg9[%c0_21, %c0_22] : memref<1x1xf32, #tpu.memory_space<smem>>
    %33 = vector.broadcast %32 : f32 to vector<1x128xf32>
    %34 = arith.addf %31, %33 : vector<1x128xf32>
    %c0_23 = arith.constant 0 : index
    %c0_24 = arith.constant 0 : index
    %35 = vector.load %arg10[%c0_23, %c0_24] : memref<1x128xf32, #tpu.memory_space<vmem>>, vector<1x128xf32>
    tpu.vector_store %arg10[%c0_23, %c0_24], %34 {strides = array<i32>} : memref<1x128xf32, #tpu.memory_space<vmem>>, vector<1x128xf32>,
    return
  }
  func.func @transform_0(%arg0: i32) -> (i32, i32) {
    %c0_i32 = arith.constant 0 : i32
    %c0_i32_0 = arith.constant 0 : i32
    return %arg0, %c0_i32 : i32, i32
  }
  func.func @transform_1(%arg0: i32) -> (i32, i32) {
    %c0_i32 = arith.constant 0 : i32
    %c0_i32_0 = arith.constant 0 : i32
    %c0_i32_1 = arith.constant 0 : i32
    return %c0_i32, %c0_i32_0 : i32, i32
  }
  func.func @transform_2(%arg0: i32) -> (i32, i32) {
    %c0_i32 = arith.constant 0 : i32
    %c0_i32_0 = arith.constant 0 : i32
    %c0_i32_1 = arith.constant 0 : i32
    return %c0_i32, %c0_i32_0 : i32, i32
  }
  func.func @transform_3(%arg0: i32) -> (i32, i32) {
    %c0_i32 = arith.constant 0 : i32
    %c0_i32_0 = arith.constant 0 : i32
    %c0_i32_1 = arith.constant 0 : i32
    return %c0_i32, %c0_i32_0 : i32, i32
  }
  func.func @transform_4(%arg0: i32) -> (i32, i32) {
    %c0_i32 = arith.constant 0 : i32
    %c0_i32_0 = arith.constant 0 : i32
    %c0_i32_1 = arith.constant 0 : i32
    return %c0_i32, %c0_i32_0 : i32, i32
  }
  func.func @transform_5(%arg0: i32) -> (i32, i32) {
    %c0_i32 = arith.constant 0 : i32
    %c0_i32_0 = arith.constant 0 : i32
    %c0_i32_1 = arith.constant 0 : i32
    return %c0_i32, %c0_i32_0 : i32, i32
  }
  func.func @transform_6(%arg0: i32) -> (i32, i32) {
    %c0_i32 = arith.constant 0 : i32
    %c0_i32_0 = arith.constant 0 : i32
    %c0_i32_1 = arith.constant 0 : i32
    return %c0_i32, %c0_i32_0 : i32, i32
  }
  func.func @transform_7(%arg0: i32) -> (i32, i32) {
    %c0_i32 = arith.constant 0 : i32
    %c0_i32_0 = arith.constant 0 : i32
    %c0_i32_1 = arith.constant 0 : i32
    return %c0_i32, %c0_i32_0 : i32, i32
  }
  func.func @transform_8(%arg0: i32) -> (i32, i32) {
    %c0_i32 = arith.constant 0 : i32
    %c0_i32_0 = arith.constant 0 : i32
    %c0_i32_1 = arith.constant 0 : i32
    return %c0_i32, %c0_i32_0 : i32, i32
  }
  func.func @transform_9(%arg0: i32) -> (i32, i32) {
    %c0_i32 = arith.constant 0 : i32
    %c0_i32_0 = arith.constant 0 : i32
    return %c0_i32, %arg0 : i32, i32
  }
}

</mosaic_0001>

<bundles_post_ra>
// kernel: tpu_custom_call.1
= control target key start
LH: loop header
LB: loop body
LE: loop exit
PB: predicated region body
PF: predicated region fallthrough
CT: control target
= control target key end

     0   :  { %vm167_vm0 = vcmask 261120   ;;  %v764_v2 = vmov 0   ;;  %s998_s0 = inlined_call_operand.vmem [shape: bf16[128,32], index: 0, kind: input, shape index: {}]   ;;  %s999_s1 = inlined_call_operand.vmem [shape: bf16[64,32], index: 1, kind: input, shape index: {}]   ;;  %s1000_s2 = inlined_call_operand.vmem [shape: f32[64,1], index: 2, kind: input, shape index: {}]   ;;  %s1001_s3 = inlined_call_operand.vmem [shape: bf16[64,64], index: 3, kind: input, shape index: {}]   ;;  %s1002_s4 = inlined_call_operand.vmem [shape: f32[64,1], index: 4, kind: input, shape index: {}]   ;;  %s1003_s5 = inlined_call_operand.vmem [shape: bf16[64,64], index: 5, kind: input, shape index: {}]   ;;  %s1004_s6 = inlined_call_operand.vmem [shape: f32[64,1], index: 6, kind: input, shape index: {}]   ;;  %s1005_s7 = inlined_call_operand.vmem [shape: f32[64,1], index: 7, kind: input, shape index: {}]   ;;  %s1006_s8 = inlined_call_operand.<no memory space> [shape: f32[1,1], index: 8, kind: input, shape index: {}]   ;;  %s1007_s9 = inlined_call_operand.hbm [shape: f32[1,128], index: 9, kind: output, shape index: {}]  }
   0x1   :  { %v712_v0 = vld [vmem:[%s998_s0 + $0x38] sm:$0xff]  ;;  %v65_v1 = vld [vmem:[%s1000_s2 + $0x30] sm:$0xff]  ;;  %735 = vset.pattern.permute.xlu0 %v764_v2  ;;  %736 = vset.pattern.permute.xlu1 %v764_v2  ;;  %v63_v3 = vld [vmem:[%s1000_s2 + $0x20] sm:$0xff] }
   0x2   :  { %v202_v4 = vsel %vm167_vm0, %v712_v0, 0  ;;  %99 = vperm.xlu0 %735, %v65_v1   ;;  %89 = vperm.xlu1 %736, %v63_v3   ;;  %v711_v5 = vld [vmem:[%s998_s0 + $0x30] sm:$0xff] }
   0x3   :  { %725 = vmatpush.bf16.xpose.msra.mxu3 %v202_v4  ;;  %204 = vmatpush.bf16.xpose.msra.mxu0 %v202_v4 }
   0x4   :  { %737 = vset.pattern.permute.xlu2 %v764_v2 }
   0x5   :  { %15 = vsyncpa [#allocation4], 0  ;;  %v66_v6 = vld [vmem:[%s1000_s2 + $0x38] sm:$0xff]  ;;  %v64_v7 = vld [vmem:[%s1000_s2 + $0x28] sm:$0xff]  ;;  %v199_v8 = vsel %vm167_vm0, %v711_v5, 0  ;;  %vm329_vm1 = vcmask 523264  }
   0x6   :  { %v710_v9 = vld [vmem:[%s998_s0 + $0x28] sm:$0xff]  ;;  %v59_v10 = vld [vmem:[%s1000_s2] sm:$0xff]  ;;  %v61_v13 = vld [vmem:[%s1000_s2 + $0x10] sm:$0xff]  ;;  %s765_s19 = smov [#allocation3]   ;;  %s604_s23 = sshll.u32 %s1007_s9, 4  ;;  %s605_s23 = int_to_ptr.hbm [resolvable:$true] %s604_s23 }
   0x7   :  { %v60_v11 = vld [vmem:[%s1000_s2 + $0x8] sm:$0xff]  ;;  %v196_v12 = vsel %vm167_vm0, %v710_v9, 0  ;;  %v709_v14 = vld [vmem:[%s998_s0 + $0x20] sm:$0xff]  ;;  %79 = vperm.xlu2 %737, %v61_v13   ;;  %v268_v15 = vld [vmem:[%s1002_s4 + $0x38] sm:$0xff]  ;;  %s602_s20 = sshll.u32 %s765_s19, 4  ;;  %s603_s20 = int_to_ptr.vmem [resolvable:$true] %s602_s20 }
   0x8   :  { %v265_v16 = vld [vmem:[%s1002_s4 + $0x20] sm:$0xff]  ;;  %v193_v17 = vsel %vm167_vm0, %v709_v14, 0  ;;  %v708_v18 = vld [vmem:[%s998_s0 + $0x18] sm:$0xff]  ;;  %v263_v19 = vld [vmem:[%s1002_s4 + $0x10] sm:$0xff] }
   0x9   :  { %v264_v20 = vld [vmem:[%s1002_s4 + $0x18] sm:$0xff]  ;;  %v190_v21 = vsel %vm167_vm0, %v708_v18, 0  ;;  %v707_v23 = vld [vmem:[%s998_s0 + $0x10] sm:$0xff]  ;;  %v262_v24 = vld [vmem:[%s1002_s4 + $0x8] sm:$0xff] }
   0xa   :  { %104 = vperm.xlu0 %735, %v66_v6   ;;  %94 = vperm.xlu1 %736, %v64_v7   ;;  %v62_v22 = vld [vmem:[%s1000_s2 + $0x18] sm:$0xff]  ;;  %v399_v25 = vld [vmem:[%s1004_s6] sm:$0xff]  ;;  %v187_v26 = vsel %vm167_vm0, %v707_v23, 0  ;;  %v267_v27 = vld [vmem:[%s1002_s4 + $0x30] sm:$0xff] }
   0xb   :  { %726 = vmatpush.bf16.xpose.msra.mxu3 %v199_v8  ;;  %205 = vmatpush.bf16.xpose.msra.mxu0 %v199_v8  ;;  %v706_v28 = vld [vmem:[%s998_s0 + $0x8] sm:$0xff]  ;;  %v401_v29 = vld [vmem:[%s1004_s6 + $0x10] sm:$0xff]  ;;  %v402_v30 = vld [vmem:[%s1004_s6 + $0x18] sm:$0xff] }
   0xc   :  { %v184_v31 = vsel %vm167_vm0, %v706_v28, 0  ;;  %v266_v32 = vld [vmem:[%s1002_s4 + $0x28] sm:$0xff]  ;;  %v705_v33 = vld [vmem:[%s998_s0] sm:$0xff]  ;;  %v715_v38 = vld [vmem:[%s999_s1 + $0x10] sm:$0xff] }
   0xd   :  { %v524_v34 = vld [vmem:[%s1005_s7] sm:$0xff]  ;;  %v525_v35 = vld [vmem:[%s1005_s7 + $0x8] sm:$0xff]  ;;  %v181_v36 = vsel %vm167_vm0, %v705_v33, 0  ;;  %v526_v40 = vld [vmem:[%s1005_s7 + $0x10] sm:$0xff] }
   0xe   :  { %v261_v37 = vld [vmem:[%s1002_s4] sm:$0xff]  ;;  %v405_v41 = vld [vmem:[%s1004_s6 + $0x30] sm:$0xff]  ;;  %v400_v42 = vld [vmem:[%s1004_s6 + $0x8] sm:$0xff] }
   0xf   :  { %84 = vperm.xlu2 %737, %v62_v22   ;;  %v713_v39 = vld [vmem:[%s999_s1] sm:$0xff]  ;;  %v406_v43 = vld [vmem:[%s1004_s6 + $0x38] sm:$0xff]  ;;  %v714_v47 = vld [vmem:[%s999_s1 + $0x8] sm:$0xff] }
  0x10   :  { %v528_v44 = vld [vmem:[%s1005_s7 + $0x20] sm:$0xff]  ;;  %v716_v46 = vld [vmem:[%s999_s1 + $0x18] sm:$0xff]  ;;  %v530_v48 = vld [vmem:[%s1005_s7 + $0x30] sm:$0xff] }
  0x11   :  { %v403_v45 = vld [vmem:[%s1004_s6 + $0x20] sm:$0xff]  ;;  %v531_v49 = vld [vmem:[%s1005_s7 + $0x38] sm:$0xff]  ;;  %v404_v50 = vld [vmem:[%s1004_s6 + $0x28] sm:$0xff] }
  0x12   :  { %69 = vperm.xlu0 %735, %v59_v10   ;;  %74 = vperm.xlu1 %736, %v60_v11   ;;  %v527_v51 = vld [vmem:[%s1005_s7 + $0x18] sm:$0xff]  ;;  %v529_v52 = vld [vmem:[%s1005_s7 + $0x28] sm:$0xff]  ;;  %v717_v33 = vld [vmem:[%s1001_s3] sm:$0xff] }
  0x13   :  { %727 = vmatpush.bf16.xpose.msra.mxu3 %v196_v12  ;;  %206 = vmatpush.bf16.xpose.msra.mxu0 %v196_v12 }
  0x17   :  { %301 = vperm.xlu2 %737, %v267_v27  }
  0x1a   :  { %306 = vperm.xlu0 %735, %v268_v15   ;;  %291 = vperm.xlu1 %736, %v265_v16  }
  0x1b   :  { %728 = vmatpush.bf16.xpose.msra.mxu3 %v193_v17  ;;  %207 = vmatpush.bf16.xpose.msra.mxu0 %v193_v17 }
  0x1f   :  { %296 = vperm.xlu2 %737, %v266_v32  }
  0x22   :  { %281 = vperm.xlu0 %735, %v263_v19   ;;  %286 = vperm.xlu1 %736, %v264_v20  }
  0x23   :  { %729 = vmatpush.bf16.xpose.msra.mxu3 %v190_v21  ;;  %208 = vmatpush.bf16.xpose.msra.mxu0 %v190_v21 }
  0x27   :  { %271 = vperm.xlu2 %737, %v261_v37  }
  0x2a   :  { %276 = vperm.xlu0 %735, %v262_v24   ;;  %409 = vperm.xlu1 %736, %v399_v25  }
  0x2b   :  { %730 = vmatpush.bf16.xpose.msra.mxu3 %v187_v26  ;;  %209 = vmatpush.bf16.xpose.msra.mxu0 %v187_v26 }
  0x2f   :  { %414 = vperm.xlu2 %737, %v400_v42  }
  0x32   :  { %419 = vperm.xlu0 %735, %v401_v29   ;;  %424 = vperm.xlu1 %736, %v402_v30  }
  0x33   :  { %731 = vmatpush.bf16.xpose.msra.mxu3 %v184_v31  ;;  %210 = vmatpush.bf16.xpose.msra.mxu0 %v184_v31 }
  0x37   :  { %429 = vperm.xlu2 %737, %v403_v45  }
  0x3a   :  { %534 = vperm.xlu0 %735, %v524_v34   ;;  %539 = vperm.xlu1 %736, %v525_v35   ;;  %v718_v34 = vld [vmem:[%s1001_s3 + $0x8] sm:$0xff]  ;;  %v719_v35 = vld [vmem:[%s1001_s3 + $0x10] sm:$0xff] }
  0x3b   :  { %732 = vmatpush.bf16.xpose.msra.mxu3 %v181_v36  ;;  %211 = vmatpush.bf16.xpose.msra.mxu0 %v181_v36  ;;  %v720_v36 = vld [vmem:[%s1001_s3 + $0x18] sm:$0xff] }
  0x3f   :  { %434 = vperm.xlu2 %737, %v404_v50  }
  0x42   :  { %663 = vmatmul.msk.bf16.vlgmr.msra.gmra.mxu3 %vm167_vm0, %v715_v38  ;;  %661 = vmatmul.msk.bf16.vlgmr.msra.gmra.mxu0 %vm167_vm0, %v713_v39 }
  0x43   :  { %544 = vperm.xlu0 %735, %v526_v40   ;;  %439 = vperm.xlu1 %736, %v405_v41  }
  0x47   :  { %549 = vperm.xlu2 %737, %v527_v51  }
  0x4b   :  { %444 = vperm.xlu0 %735, %v406_v43   ;;  %554 = vperm.xlu1 %736, %v528_v44  }
  0x4f   :  { %559 = vperm.xlu2 %737, %v529_v52  }
  0x52   :  { %664 = vmatmul.msk.bf16.gmra.mxu3 %vm167_vm0, %v716_v46  ;;  %662 = vmatmul.msk.bf16.gmra.mxu0 %vm167_vm0, %v714_v47 }
  0x53   :  { %564 = vperm.xlu0 %735, %v530_v48   ;;  %569 = vperm.xlu1 %736, %v531_v49  }
  0x61   :  { %v80_v60 = vpop.permute.xlu2 %79 }
  0x69   :  { %v85_v7 = vpop.permute.xlu2 %84 }
  0x71   :  { %v302_v44 = vpop.permute.xlu2 %301 }
  0x74   :  { %v100_v57 = vpop.permute.xlu0 %99  ;;  %v90_v58 = vpop.permute.xlu1 %89 }
  0x79   :  { %v297_v49 = vpop.permute.xlu2 %296 }
  0x7c   :  { %v105_v62 = vpop.permute.xlu0 %104  ;;  %v95_v63 = vpop.permute.xlu1 %94 }
  0x84   :  { %v70_v12 = vpop.permute.xlu0 %69  ;;  %v75_v13 = vpop.permute.xlu1 %74 }
  0x8c   :  { %v307_v43 = vpop.permute.xlu0 %306  ;;  %v292_v45 = vpop.permute.xlu1 %291 }
  0x94   :  { %v282_v47 = vpop.permute.xlu0 %281 }
  0xbf   :  { %v213_v53 = vpop.f32.mrf.mxu0 }
  0xc0   :  { %v214_v17 = vadd.f32 %v213_v53, %v70_v12 }
  0xc2   :  { %v233_v24 = vmul.f32 0.2, %v214_v17 }
  0xc4   :  { %v241_v29 = vmax.f32 %v214_v17, %v233_v24  ;;  %v721_v17 = vld [vmem:[%s1003_s5] sm:$0xff] }
  0xc5   :  { %v223_v54 = vpop.f32.mrf.mxu3 }
  0xc6   :  { %v224_v4 = vadd.f32 %v223_v54, %v90_v58 }
  0xc7   :  { %v215_v55 = vpop.f32.mrf.mxu0 }
  0xc8   :  { %v237_v14 = vmul.f32 0.2, %v224_v4  ;;  %v216_v18 = vadd.f32 %v215_v55, %v75_v13  ;;  %v287_v55 = vpop.permute.xlu1 %286 }
  0xca   :  { %v245_v23 = vmax.f32 %v224_v4, %v237_v14  ;;  %v234_v25 = vmul.f32 0.2, %v216_v18  ;;  %v272_v4 = vpop.permute.xlu2 %271 }
  0xcc   :  { %v242_v30 = vmax.f32 %v216_v18, %v234_v25  ;;  %v722_v18 = vld [vmem:[%s1003_s5 + $0x8] sm:$0xff] }
  0xcd   :  { %v225_v56 = vpop.f32.mrf.mxu3 }
  0xce   :  { %v226_v1 = vadd.f32 %v225_v56, %v95_v63  ;;  %v257_v32 = vpack.c.bf16 %v242_v30, %v241_v29  ;;  %v277_v63 = vpop.permute.xlu0 %276 }
  0xcf   :  { %v218_v59 = vpop.f32.mrf.mxu0 }
  0xd0   :  { %v238_v8 = vmul.f32 0.2, %v226_v1  ;;  %v219_v9 = vadd.f32 %v218_v59, %v80_v60 }
  0xd2   :  { %v246_v19 = vmax.f32 %v226_v1, %v238_v8  ;;  %v235_v20 = vmul.f32 0.2, %v219_v9  ;;  %v415_v24 = vpop.permute.xlu2 %414 }
  0xd4   :  { %v243_v26 = vmax.f32 %v219_v9, %v235_v20  ;;  %v259_v28 = vpack.c.bf16 %v246_v19, %v245_v23  ;;  %v723_v19 = vld [vmem:[%s1003_s5 + $0x10] sm:$0xff]  ;;  %v724_v20 = vld [vmem:[%s1003_s5 + $0x18] sm:$0xff]  ;;  %v410_v23 = vpop.permute.xlu1 %409 }
  0xd5   :  { %v228_v61 = vpop.f32.mrf.mxu3 }
  0xd6   :  { %v229_v0 = vadd.f32 %v228_v61, %v100_v57 }
  0xd7   :  { %v220_v2 = vpop.f32.mrf.mxu0 }
  0xd8   :  { %v239_v5 = vmul.f32 0.2, %v229_v0  ;;  %v221_v10 = vadd.f32 %v220_v2, %v85_v7 }
  0xda   :  { %v247_v15 = vmax.f32 %v229_v0, %v239_v5  ;;  %v236_v21 = vmul.f32 0.2, %v221_v10  ;;  %v430_v29 = vpop.permute.xlu2 %429 }
  0xdc   :  { %v244_v27 = vmax.f32 %v221_v10, %v236_v21 }
  0xdd   :  { %v230_v3 = vpop.f32.mrf.mxu3 }
  0xde   :  { %v231_v6 = vadd.f32 %v230_v3, %v105_v62  ;;  %v258_v31 = vpack.c.bf16 %v244_v27, %v243_v26  ;;  %v420_v26 = vpop.permute.xlu0 %419  ;;  %v425_v27 = vpop.permute.xlu1 %424 }
  0xe0   :  { %v240_v11 = vmul.f32 0.2, %v231_v6 }
  0xe2   :  { %v248_v16 = vmax.f32 %v231_v6, %v240_v11 }
  0xe4   :  { %v260_v22 = vpack.c.bf16 %v248_v16, %v247_v15 }
  0xe6   :  { %346 = vmatpush.bf16.msra.mxu1 %v260_v22  ;;  %v535_v30 = vpop.permute.xlu0 %534 }
  0xea   :  { %347 = vmatpush.bf16.msra.mxu1 %v259_v28 }
  0xee   :  { %348 = vmatpush.bf16.msra.mxu1 %v258_v31  ;;  %v540_v31 = vpop.permute.xlu1 %539 }
  0xf2   :  { %349 = vmatpush.bf16.msra.mxu1 %v257_v32 }
  0xf5   :  { %681 = vmatmul.msk.bf16.vlgmr.msra.gmra.mxu1 %vm329_vm1, %v717_v33  ;;  %v435_v33 = vpop.permute.xlu2 %434 }
 0x105   :  { %682 = vmatmul.msk.bf16.gmra.mxu1 %vm329_vm1, %v718_v34 }
 0x115   :  { %683 = vmatmul.msk.bf16.gmra.mxu1 %vm329_vm1, %v719_v35  ;;  %v545_v35 = vpop.permute.xlu0 %544 }
 0x125   :  { %684 = vmatmul.msk.bf16.gmra.mxu1 %vm329_vm1, %v720_v36 }
 0x172   :  { %v351_v37 = vpop.f32.mrf.mxu1 }
 0x173   :  { %v352_v5 = vadd.f32 %v351_v37, %v272_v4 }
 0x175   :  { %v371_v11 = vmul.f32 0.2, %v352_v5 }
 0x177   :  { %v379_v15 = vmax.f32 %v352_v5, %v371_v11 }
 0x17a   :  { %v353_v38 = vpop.f32.mrf.mxu1 }
 0x17b   :  { %v354_v0 = vadd.f32 %v353_v38, %v277_v63 }
 0x17d   :  { %v372_v8 = vmul.f32 0.2, %v354_v0 }
 0x17f   :  { %v380_v13 = vmax.f32 %v354_v0, %v372_v8 }
 0x181   :  { %v395_v16 = vpack.c.bf16 %v380_v13, %v379_v15 }
 0x182   :  { %v356_v39 = vpop.f32.mrf.mxu1 }
 0x183   :  { %v357_v59 = vadd.f32 %v356_v39, %v282_v47 }
 0x185   :  { %v373_v6 = vmul.f32 0.2, %v357_v59 }
 0x187   :  { %v381_v12 = vmax.f32 %v357_v59, %v373_v6 }
 0x18a   :  { %v358_v40 = vpop.f32.mrf.mxu1 }
 0x18b   :  { %v359_v56 = vadd.f32 %v358_v40, %v287_v55 }
 0x18d   :  { %v374_v1 = vmul.f32 0.2, %v359_v56 }
 0x18f   :  { %v382_v9 = vmax.f32 %v359_v56, %v374_v1 }
 0x191   :  { %v396_v14 = vpack.c.bf16 %v382_v9, %v381_v12 }
 0x192   :  { %v361_v41 = vpop.f32.mrf.mxu1 }
 0x193   :  { %v362_v52 = vadd.f32 %v361_v41, %v292_v45  ;;  %v440_v41 = vpop.permute.xlu1 %439 }
 0x195   :  { %v375_v60 = vmul.f32 0.2, %v362_v52 }
 0x197   :  { %v383_v7 = vmax.f32 %v362_v52, %v375_v60  ;;  %v445_v52 = vpop.permute.xlu0 %444 }
 0x19a   :  { %v363_v42 = vpop.f32.mrf.mxu1 }
 0x19b   :  { %v364_v50 = vadd.f32 %v363_v42, %v297_v49 }
 0x19d   :  { %v376_v57 = vmul.f32 0.2, %v364_v50 }
 0x19f   :  { %v384_v2 = vmax.f32 %v364_v50, %v376_v57 }
 0x1a1   :  { %v397_v10 = vpack.c.bf16 %v384_v2, %v383_v7 }
 0x1a2   :  { %v366_v46 = vpop.f32.mrf.mxu1 }
 0x1a3   :  { %v367_v48 = vadd.f32 %v366_v46, %v302_v44 }
 0x1a5   :  { %v377_v53 = vmul.f32 0.2, %v367_v48 }
 0x1a7   :  { %v385_v61 = vmax.f32 %v367_v48, %v377_v53  ;;  %v550_v48 = vpop.permute.xlu2 %549 }
 0x1aa   :  { %v368_v51 = vpop.f32.mrf.mxu1 }
 0x1ab   :  { %v369_v54 = vadd.f32 %v368_v51, %v307_v43 }
 0x1ad   :  { %v378_v58 = vmul.f32 0.2, %v369_v54 }
 0x1af   :  { %v386_v62 = vmax.f32 %v369_v54, %v378_v58  ;;  %v560_v5 = vpop.permute.xlu2 %559 }
 0x1b1   :  { %v398_v3 = vpack.c.bf16 %v386_v62, %v385_v61  ;;  %v555_v62 = vpop.permute.xlu1 %554 }
 0x1b3   :  { %483 = vmatpush.bf16.msra.mxu2 %v398_v3 }
 0x1b7   :  { %484 = vmatpush.bf16.msra.mxu2 %v397_v10  ;;  %v565_v10 = vpop.permute.xlu0 %564 }
 0x1bb   :  { %485 = vmatpush.bf16.msra.mxu2 %v396_v14 }
 0x1bf   :  { %486 = vmatpush.bf16.msra.mxu2 %v395_v16  ;;  %v570_v16 = vpop.permute.xlu1 %569 }
 0x1c2   :  { %701 = vmatmul.msk.bf16.vlgmr.msra.gmra.mxu2 %vm329_vm1, %v721_v17 }
 0x1d2   :  { %702 = vmatmul.msk.bf16.gmra.mxu2 %vm329_vm1, %v722_v18 }
 0x1e2   :  { %703 = vmatmul.msk.bf16.gmra.mxu2 %vm329_vm1, %v723_v19 }
 0x1f2   :  { %704 = vmatmul.msk.bf16.gmra.mxu2 %vm329_vm1, %v724_v20 }
 0x245   :  { %v488_v21 = vpop.f32.mrf.mxu2 }
 0x246   :  { %v489_v36 = vadd.f32 %v488_v21, %v410_v23 }
 0x248   :  { %v508_v42 = vmul.f32 0.2, %v489_v36 }
 0x24a   :  { %v516_v49 = vmax.f32 %v489_v36, %v508_v42 }
 0x24c   :  { %v572_v58 = vmul.f32 %v535_v30, %v516_v49 }
 0x24d   :  { %v490_v22 = vpop.f32.mrf.mxu2 }
 0x24e   :  { %v491_v34 = vadd.f32 %v490_v22, %v415_v24 }
 0x250   :  { %v509_v39 = vmul.f32 0.2, %v491_v34 }
 0x252   :  { %v517_v45 = vmax.f32 %v491_v34, %v509_v39 }
 0x254   :  { %v573_v54 = vmul.f32 %v540_v31, %v517_v45 }
 0x255   :  { %v493_v25 = vpop.f32.mrf.mxu2 }
 0x256   :  { %v494_v37 = vadd.f32 %v493_v25, %v420_v26  ;;  %v580_v63 = vadd.f32 %v573_v54, %v572_v58  ;;  %v594_v25 = vstv %s1006_s8 }
 0x258   :  { %v510_v43 = vmul.f32 0.2, %v494_v37 }
 0x25a   :  { %v518_v50 = vmax.f32 %v494_v37, %v510_v43 }
 0x25c   :  { %v574_v59 = vmul.f32 %v545_v35, %v518_v50 }
 0x25d   :  { %v495_v28 = vpop.f32.mrf.mxu2 }
 0x25e   :  { %v496_v40 = vadd.f32 %v495_v28, %v425_v27  ;;  %v581_v2 = vadd.f32 %v580_v63, %v574_v59 }
 0x260   :  { %v511_v46 = vmul.f32 0.2, %v496_v40 }
 0x262   :  { %v519_v55 = vmax.f32 %v496_v40, %v511_v46 }
 0x264   :  { %v575_v0 = vmul.f32 %v550_v48, %v519_v55 }
 0x265   :  { %v498_v32 = vpop.f32.mrf.mxu2 }
 0x266   :  { %v499_v44 = vadd.f32 %v498_v32, %v430_v29  ;;  %v582_v7 = vadd.f32 %v581_v2, %v575_v0 }
 0x268   :  { %v512_v51 = vmul.f32 0.2, %v499_v44 }
 0x26a   :  { %v520_v60 = vmax.f32 %v499_v44, %v512_v51 }
 0x26c   :  { %v576_v3 = vmul.f32 %v555_v62, %v520_v60 }
 0x26d   :  { %v500_v38 = vpop.f32.mrf.mxu2 }
 0x26e   :  { %v501_v47 = vadd.f32 %v500_v38, %v435_v33  ;;  %v583_v11 = vadd.f32 %v582_v7, %v576_v3 }
 0x270   :  { %v513_v56 = vmul.f32 0.2, %v501_v47 }
 0x272   :  { %v521_v1 = vmax.f32 %v501_v47, %v513_v56 }
 0x274   :  { %v577_v8 = vmul.f32 %v560_v5, %v521_v1 }
 0x275   :  { %v503_v53 = vpop.f32.mrf.mxu2 }
 0x276   :  { %v504_v57 = vadd.f32 %v503_v53, %v440_v41  ;;  %v584_v14 = vadd.f32 %v583_v11, %v577_v8 }
 0x278   :  { %v514_v61 = vmul.f32 0.2, %v504_v57 }
 0x27a   :  { %v522_v4 = vmax.f32 %v504_v57, %v514_v61 }
 0x27c   :  { %v578_v12 = vmul.f32 %v565_v10, %v522_v4 }
 0x27d   :  { %v505_v6 = vpop.f32.mrf.mxu2 }
 0x27e   :  { %v506_v9 = vadd.f32 %v505_v6, %v445_v52  ;;  %v585_v17 = vadd.f32 %v584_v14, %v578_v12 }
 0x280   :  { %v515_v13 = vmul.f32 0.2, %v506_v9 }
 0x282   :  { %v523_v15 = vmax.f32 %v506_v9, %v515_v13 }
 0x284   :  { %v579_v18 = vmul.f32 %v570_v16, %v523_v15 }
 0x286   :  { %v586_v19 = vadd.f32 %v585_v17, %v579_v18 }
 0x288   :  { %v587_v20 = vrot.slane %v586_v19, 4 }
 0x28a   :  { %v588_v21 = vadd.f32 %v587_v20, %v586_v19 }
 0x28c   :  { %v589_v22 = vrot.slane %v588_v21, 2 }
 0x28e   :  { %v590_v23 = vadd.f32 %v589_v22, %v588_v21 }
 0x290   :  { %v591_v24 = vrot.slane %v590_v23, 1 }
 0x292   :  { %v592_v26 = vadd.f32 %v591_v24, %v590_v23 }
 0x294   :  { %v595_v27 = vadd.f32 %v594_v25, %v592_v26 }
 0x296   :  { %596 = vst [vmem:[#allocation3] sm:$0x1] %v595_v27 }
 0x297   :  { %607 = dma.vmem_to_hbm [thread:$0]  %s603_s20, 16, %s605_s23, [#allocation4]  }
 0x298   :  { %762 = dma.done.wait [#allocation4], 16  }
 0x299   :  { %763 = vsyncadd [#allocation4], 4294967280 }
 0x29a   :  { %612 = vsyncpa [#allocation4], 1 }

</bundles_post_ra>
